<compile_context>
chip_gen: v5e
topology: v5e:2x2
jax: 0.10.0
libtpu: 0.0.40
codegen_flags: <defaults>
</compile_context>

<pallas_src>
import functools

import jax
import jax.numpy as jnp
from jax.experimental import pallas as pl
from jax.experimental.pallas import tpu as pltpu


# ----------------------------- helpers (host side) -----------------------------

def _round_up(x, m):
    return (x + m - 1) // m * m


def _pad2(x, rows, cols):
    return jnp.pad(x, ((0, rows - x.shape[0]), (0, cols - x.shape[1])))


def _gate_cols_w(w, in_pad, h, h_pad):
    # torch gate-major (3h, in) -> (in_pad, 3*h_pad): one 128-lane block per gate.
    return jnp.concatenate(
        [_pad2(w[g * h:(g + 1) * h, :].T, in_pad, h_pad) for g in range(3)], axis=1)


def _fold_bias(b_ih, b_hh, h, h_pad):
    # Fold r/z hidden biases into the input bias (added once in the batched input
    # projection).  The n-gate hidden bias must stay inside r * (W_hn h + b_hn),
    # so it is kept separate (see *_hhn kernel params).
    parts = []
    for g in range(3):
        b = b_ih[g * h:(g + 1) * h]
        if g < 2:
            b = b + b_hh[g * h:(g + 1) * h]
        parts.append(jnp.pad(b, (0, h_pad - h)))
    return jnp.concatenate(parts)[None, :]


def _vmem_budget(tile_t, stream_cols_f32, weight_bytes):
    # double-buffered streamed rows + resident weights + headroom, clamped so the
    # same setting is safe on v7x (64 MiB physical VMEM).
    streamed = 4 * tile_t * stream_cols_f32
    need = 2 * streamed + weight_bytes + (4 << 20)
    return int(min(max(need, 16 << 20), 48 << 20))


def _weight_bytes(arrays):
    return sum(int(a.size) * a.dtype.itemsize for a in arrays)


# ----------------------------- Pallas kernels -----------------------------

def _project_kernel(feat_ref, w1ih_ref, b1ih_ref, w2ihf_ref, b2ih_ref,
                    xp1_ref, xp2_ref):
    # Batched input->hidden projections for both GRUs over a whole T-tile.
    # r/z hidden biases are already folded into b1ih / b2ih host-side.
    feat = feat_ref[...].astype(jnp.bfloat16)
    xp1_ref[...] = jnp.dot(feat, w1ih_ref[...],
                           preferred_element_type=jnp.float32) + b1ih_ref[...]
    xp2_ref[...] = jnp.dot(feat, w2ihf_ref[...],
                           preferred_element_type=jnp.float32) + b2ih_ref[...]


def _recurrence_kernel(chunk, H1P, H2P,
                       xp1_ref, xp2_ref,
                       w1hh_ref, b1hhn_ref, w2fh1_ref, w2fh2_ref, b2hhn_ref,
                       hid_ref,
                       h1_ref, h2_ref, gh1_ref, g2h2_ref):
    tile_t = xp1_ref.shape[0]
    n_chunks = tile_t // chunk

    # State init on the first grid step; scratch persists across grid steps.
    @pl.when(pl.program_id(0) == 0)
    def _init():
        h1_ref[...] = jnp.zeros_like(h1_ref)       # h1 == 0
        h2_ref[...] = jnp.zeros_like(h2_ref)       # h2 == 0
        gh1_ref[...] = jnp.zeros_like(gh1_ref)     # h1 @ W1hh  == 0
        g2h2_ref[...] = jnp.zeros_like(g2h2_ref)   # h2 @ W2f_h2 == 0

    # Hoist small loop-invariant bias vectors; weight matrices stay as refs.
    b1hhn = b1hhn_ref[...]
    b2hhn = b2hhn_ref[...]

    def chunk_body(c, carry):
        h1, h2, gh1, g2h2 = carry        # gh1 = h1_{t-1}@W1hh, g2h2 = h2_{t-1}@W2f_h2
        base = pl.multiple_of(c * chunk, chunk)
        # Chunked loads instead of per-row dynamic loads.
        xp1_c = xp1_ref[pl.ds(base, chunk), :]
        xp2_c = xp2_ref[pl.ds(base, chunk), :]
        rows = []
        for s in range(chunk):                     # static unroll inside the chunk
            # --- noise-model GRU step (hidden projection carried from prev step) ---
            gx1 = xp1_c[s:s + 1, :]
            rz1 = jax.nn.sigmoid(gx1[:, :2 * H1P] + gh1[:, :2 * H1P])   # fused r|z
            r1, z1 = rz1[:, :H1P], rz1[:, H1P:]
            n1 = jnp.tanh(gx1[:, 2 * H1P:] + r1 * (gh1[:, 2 * H1P:] + b1hhn))
            h1 = (1.0 - z1) * n1 + z1 * h1
            h1b = h1.astype(jnp.bfloat16)
            # Next step's hidden->hidden projection (pipelined off the critical path).
            gh1 = jnp.dot(h1b, w1hh_ref[...], preferred_element_type=jnp.float32)
            # h1 -> enhancer gate contribution (the only matmul left on the chain).
            g2h1 = jnp.dot(h1b, w2fh1_ref[...], preferred_element_type=jnp.float32)

            # --- enhancer GRU step (h2 projection g2h2 carried from prev step) ---
            gx2 = xp2_c[s:s + 1, :]
            rz2 = jax.nn.sigmoid(gx2[:, :2 * H2P] + g2h1[:, :2 * H2P]
                                 + g2h2[:, :2 * H2P])                   # fused r|z
            r2, z2 = rz2[:, :H2P], rz2[:, H2P:]
            n2 = jnp.tanh(gx2[:, 2 * H2P:] + g2h1[:, 2 * H2P:]
                          + r2 * (g2h2[:, 2 * H2P:] + b2hhn))
            h2 = (1.0 - z2) * n2 + z2 * h2
            # Next step's h2 hidden projection (pipelined).
            g2h2 = jnp.dot(h2.astype(jnp.bfloat16), w2fh2_ref[...],
                           preferred_element_type=jnp.float32)
            rows.append(h2)
        # One dense (chunk, H2P) store instead of `chunk` masked 1-row stores.
        hid_ref[pl.ds(base, chunk), :] = jnp.concatenate(rows, axis=0)
        return h1, h2, gh1, g2h2

    h1, h2, gh1, g2h2 = jax.lax.fori_loop(
        0, n_chunks, chunk_body,
        (h1_ref[...], h2_ref[...], gh1_ref[...], g2h2_ref[...]))
    h1_ref[...] = h1
    h2_ref[...] = h2
    gh1_ref[...] = gh1
    g2h2_ref[...] = g2h2


def _gains_kernel(hid_ref, re_ref, im_ref, wd_ref, bd_ref, out_re_ref, out_im_ref):
    # dense_output: Linear + Sigmoid -> gains; apply to the complex spectrum.
    gains = jax.nn.sigmoid(
        jnp.dot(hid_ref[...].astype(jnp.bfloat16), wd_ref[...],
                preferred_element_type=jnp.float32) + bd_ref[...])
    out_re_ref[...] = re_ref[...] * gains
    out_im_ref[...] = im_ref[...] * gains


# ----------------------------- core driver -----------------------------

def enhancer_core(feat, spec_re, spec_im, kp, *, tile_t=256, chunk=8):
    """Run the GRU/GRU/dense/gain core. feat/spec_* are (T, F) float32."""
    T, F = feat.shape
    FP = kp['w1ih'].shape[0]
    H1P = kp['w1hh'].shape[0]
    H2P = kp['wd'].shape[0]
    assert chunk % 8 == 0
    # Adaptive tile: big tiles amortize grid/DMA overhead, but do not pad short
    # sequences beyond a chunk multiple.
    tile_t = max(chunk, min(_round_up(tile_t, chunk), _round_up(T, chunk)))
    T_pad = _round_up(max(T, tile_t), tile_t)

    def pad_seq(x):
        return jnp.pad(x, ((0, T_pad - T), (0, FP - F)))

    feat_p, re_p, im_p = pad_seq(feat), pad_seq(spec_re), pad_seq(spec_im)

    grid = (T_pad // tile_t,)
    seq = lambda cols: pl.BlockSpec((tile_t, cols), lambda i: (i, 0))
    full = lambda x: pl.BlockSpec(x.shape, lambda i: (0, 0))

    # ---- 1) batched input projections (parallel over T tiles / TensorCores) ----
    proj_w = [kp['w1ih'], kp['b1ih'], kp['w2ihf'], kp['b2ih']]
    xp1, xp2 = pl.pallas_call(
        _project_kernel,
        grid=grid,
        out_shape=(jax.ShapeDtypeStruct((T_pad, 3 * H1P), jnp.float32),
                   jax.ShapeDtypeStruct((T_pad, 3 * H2P), jnp.float32)),
        in_specs=[seq(FP)] + [full(w) for w in proj_w],
        out_specs=(seq(3 * H1P), seq(3 * H2P)),
        compiler_params=pltpu.CompilerParams(
            dimension_semantics=("parallel",),
            vmem_limit_bytes=_vmem_budget(
                tile_t, FP + 3 * H1P + 3 * H2P, _weight_bytes(proj_w))),
    )(feat_p, *proj_w)

    # ---- 2) serial GRU/GRU recurrence (arbitrary: state carried via scratch) ----
    rec_w = [kp['w1hh'], kp['b1hhn'], kp['w2fh1'], kp['w2fh2'], kp['b2hhn']]
    hid = pl.pallas_call(
        functools.partial(_recurrence_kernel, chunk, H1P, H2P),
        grid=grid,
        out_shape=jax.ShapeDtypeStruct((T_pad, H2P), jnp.float32),
        in_specs=[seq(3 * H1P), seq(3 * H2P)] + [full(w) for w in rec_w],
        out_specs=seq(H2P),
        scratch_shapes=[
            pltpu.VMEM((1, H1P), jnp.float32),        # h1   (persists across grid)
            pltpu.VMEM((1, H2P), jnp.float32),        # h2
            pltpu.VMEM((1, 3 * H1P), jnp.float32),    # pipelined h1 @ W1hh
            pltpu.VMEM((1, 3 * H2P), jnp.float32),    # pipelined h2 @ W2f_h2
        ],
        compiler_params=pltpu.CompilerParams(
            dimension_semantics=("arbitrary",),       # serial time recurrence
            vmem_limit_bytes=_vmem_budget(
                tile_t, 3 * H1P + 3 * H2P + H2P, _weight_bytes(rec_w))),
    )(xp1, xp2, *rec_w)

    # ---- 3) dense_output + gains + complex multiply (parallel over T tiles) ----
    gain_w = [kp['wd'], kp['bd']]
    out_re, out_im = pl.pallas_call(
        _gains_kernel,
        grid=grid,
        out_shape=(jax.ShapeDtypeStruct((T_pad, FP), jnp.float32),
                   jax.ShapeDtypeStruct((T_pad, FP), jnp.float32)),
        in_specs=[seq(H2P), seq(FP), seq(FP)] + [full(w) for w in gain_w],
        out_specs=(seq(FP), seq(FP)),
        compiler_params=pltpu.CompilerParams(
            dimension_semantics=("parallel",),
            vmem_limit_bytes=_vmem_budget(
                tile_t, H2P + 4 * FP, _weight_bytes(gain_w))),
    )(hid, re_p, im_p, *gain_w)

    return out_re[:T, :F], out_im[:T, :F]


# ----------------------- parameter construction / packing -----------------------

def init_params(key, F, H1, H2):
    # PyTorch-layout parameters, U(-1/sqrt(H), 1/sqrt(H)) init.
    def unif(k, shape, scale):
        return jax.random.uniform(k, shape, jnp.float32, -scale, scale)
    ks = jax.random.split(key, 10)
    s1 = 1.0 / float(H1) ** 0.5
    s2 = 1.0 / float(H2) ** 0.5
    return dict(
        w_ih1=unif(ks[0], (3 * H1, F), s1),
        w_hh1=unif(ks[1], (3 * H1, H1), s1),
        b_ih1=unif(ks[2], (3 * H1,), s1),
        b_hh1=unif(ks[3], (3 * H1,), s1),
        w_ih2=unif(ks[4], (3 * H2, F + H1), s2),
        w_hh2=unif(ks[5], (3 * H2, H2), s2),
        b_ih2=unif(ks[6], (3 * H2,), s2),
        b_hh2=unif(ks[7], (3 * H2,), s2),
        w_d=unif(ks[8], (F, H2), s2),
        b_d=unif(ks[9], (F,), s2),
    )


def prepare_kernel_params(p, F, H1, H2):
    """Pad / transpose / split torch-layout params into the lane-aligned kernel layout.

    Weights are stored bf16 (matmul operands); biases stay f32 (elementwise math).
    """
    FP = _round_up(F, 128)
    H1P = _round_up(H1, 128)
    H2P = _round_up(H2, 128)
    bf = jnp.bfloat16

    w2ih_f = p['w_ih2'][:, :F]     # applied to the spectrogram features (batched)
    w2ih_n = p['w_ih2'][:, F:]     # applied to the noise estimate h1_t (per step)

    return dict(
        w1ih=_gate_cols_w(p['w_ih1'], FP, H1, H1P).astype(bf),
        w1hh=_gate_cols_w(p['w_hh1'], H1P, H1, H1P).astype(bf),
        b1ih=_fold_bias(p['b_ih1'], p['b_hh1'], H1, H1P),
        b1hhn=jnp.pad(p['b_hh1'][2 * H1:], (0, H1P - H1))[None, :],
        w2ihf=_gate_cols_w(w2ih_f, FP, H2, H2P).astype(bf),
        b2ih=_fold_bias(p['b_ih2'], p['b_hh2'], H2, H2P),
        w2fh1=_gate_cols_w(w2ih_n, H1P, H2, H2P).astype(bf),   # h1 -> [r|z|n]
        w2fh2=_gate_cols_w(p['w_hh2'], H2P, H2, H2P).astype(bf),  # h2 -> [r|z|n]
        b2hhn=jnp.pad(p['b_hh2'][2 * H2:], (0, H2P - H2))[None, :],
        wd=_pad2(p['w_d'].T, H2P, FP).astype(bf),
        bd=jnp.pad(p['b_d'], (0, FP - F))[None, :],
    )


# ----------------------- plain-JAX glue (pre/post processing) -----------------------

def preprocess(waveform, win, hop, window):
    T = 1 + (waveform.shape[0] - win) // hop
    idx = jnp.arange(T)[:, None] * hop + jnp.arange(win)[None, :]
    frames = waveform[idx] * window[None, :]
    return jnp.fft.rfft(frames, axis=-1)          # (T, F) complex64


def postprocess(spec, win, hop, window):
    T = spec.shape[0]
    frames = jnp.fft.irfft(spec, n=win, axis=-1) * window[None, :]
    out_len = (T - 1) * hop + win
    idx = (jnp.arange(T)[:, None] * hop + jnp.arange(win)[None, :]).reshape(-1)
    wave = jnp.zeros((out_len,), jnp.float32).at[idx].add(frames.reshape(-1))
    wsum = jnp.zeros((out_len,), jnp.float32).at[idx].add(
        jnp.tile(window * window, (T,)))
    return wave / jnp.maximum(wsum, 1e-8)


def noise_model_enhancer_forward(waveform, kparams, win, hop, window,
                                 *, tile_t=256, chunk=8):
    spec = preprocess(waveform, win, hop, window)            # complex (T, F)
    feat = jnp.abs(spec).astype(jnp.float32)                 # input_features
    out_re, out_im = enhancer_core(feat,
                                   jnp.real(spec).astype(jnp.float32),
                                   jnp.imag(spec).astype(jnp.float32),
                                   kparams, tile_t=tile_t, chunk=chunk)
    est_spec = jax.lax.complex(out_re, out_im)               # input_spec * gains
    return postprocess(est_spec, win, hop, window)


if __name__ == "__main__":
    # small, module-consistent config: samplerate=2000 Hz, 32 ms window
    samplerate = 2000
    window_length_ms = 32
    win = samplerate * window_length_ms // 1000    # 64-sample window
    hop = win // 2                                 # 32
    F = win // 2 + 1                               # 33 == preprocessor.output_size
    H1, H2 = 24, 48                                # noise_model_size, enhancer_size

    key = jax.random.PRNGKey(0)
    k_wave, k_par = jax.random.split(key)
    waveform = 0.1 * jax.random.normal(k_wave, (4096,), jnp.float32)  # -> T = 127 frames
    window = 0.5 * (1.0 - jnp.cos(2.0 * jnp.pi * jnp.arange(win) / win))  # Hann

    params = init_params(k_par, F, H1, H2)
    kparams = prepare_kernel_params(params, F, H1, H2)
    # tile_t=64 -> grid=(2,): exercises the cross-tile GRU state carry.
    out = noise_model_enhancer_forward(waveform, kparams, win, hop, window,
                                       tile_t=64, chunk=8)
    jax.block_until_ready(out)
    print("KERNEL_OK")
</pallas_src>

<mosaic_0001>
module attributes {stable_mosaic.version = 11 : i64} {
  func.func @_project_kernel(%arg0: i32, %arg1: memref<64x128xf32, #tpu.memory_space<vmem>>, %arg2: memref<128x384xbf16, #tpu.memory_space<vmem>>, %arg3: memref<1x384xf32, #tpu.memory_space<vmem>>, %arg4: memref<128x384xbf16, #tpu.memory_space<vmem>>, %arg5: memref<1x384xf32, #tpu.memory_space<vmem>>, %arg6: memref<64x384xf32, #tpu.memory_space<vmem>>, %arg7: memref<64x384xf32, #tpu.memory_space<vmem>>) attributes {dimension_semantics = [#tpu.dimension_semantics<parallel>], iteration_bounds = array<i64: 2>, scalar_prefetch = 0 : i64, scratch_operands = 0 : i64, tpu.core_type = #tpu.core_type<tc>, window_params = [{transform_indices = @transform_0, window_bounds = array<i64: 64, 128>}, {pipeline_mode = #tpu.pipeline_mode<synchronous>, transform_indices = @transform_1, window_bounds = array<i64: 128, 384>}, {pipeline_mode = #tpu.pipeline_mode<synchronous>, transform_indices = @transform_2, window_bounds = array<i64: 1, 384>}, {pipeline_mode = #tpu.pipeline_mode<synchronous>, transform_indices = @transform_3, window_bounds = array<i64: 128, 384>}, {pipeline_mode = #tpu.pipeline_mode<synchronous>, transform_indices = @transform_4, window_bounds = array<i64: 1, 384>}, {transform_indices = @transform_5, window_bounds = array<i64: 64, 384>}, {transform_indices = @transform_6, window_bounds = array<i64: 64, 384>}]} {
    %c0 = arith.constant 0 : index
    %c0_0 = arith.constant 0 : index
    %0 = vector.load %arg1[%c0, %c0_0] : memref<64x128xf32, #tpu.memory_space<vmem>>, vector<64x128xf32>
    %1 = arith.truncf %0 : vector<64x128xf32> to vector<64x128xbf16>
    %c0_1 = arith.constant 0 : index
    %c0_2 = arith.constant 0 : index
    %2 = vector.load %arg2[%c0_1, %c0_2] : memref<128x384xbf16, #tpu.memory_space<vmem>>, vector<128x384xbf16>
    %cst = arith.constant dense<0.000000e+00> : vector<64x384xf32>
    %3 = tpu.matmul %1, %2, %cst {dimension_numbers = #tpu.dot_dimension_numbers<[1], [0], [0], [1], [0, 0, 1, 1], [], []>} : vector<64x128xbf16>, vector<128x384xbf16>, vector<64x384xf32> -> vector<64x384xf32>
    %c0_3 = arith.constant 0 : index
    %c0_4 = arith.constant 0 : index
    %4 = vector.load %arg3[%c0_3, %c0_4] : memref<1x384xf32, #tpu.memory_space<vmem>>, vector<1x384xf32>
    %5 = vector.broadcast %4 : vector<1x384xf32> to vector<64x384xf32>
    %6 = arith.addf %3, %5 : vector<64x384xf32>
    %c0_5 = arith.constant 0 : index
    %c0_6 = arith.constant 0 : index
    %7 = vector.load %arg6[%c0_5, %c0_6] : memref<64x384xf32, #tpu.memory_space<vmem>>, vector<64x384xf32>
    tpu.vector_store %arg6[%c0_5, %c0_6], %6 {strides = array<i32>} : memref<64x384xf32, #tpu.memory_space<vmem>>, vector<64x384xf32>,
    %c0_7 = arith.constant 0 : index
    %c0_8 = arith.constant 0 : index
    %8 = vector.load %arg4[%c0_7, %c0_8] : memref<128x384xbf16, #tpu.memory_space<vmem>>, vector<128x384xbf16>
    %cst_9 = arith.constant dense<0.000000e+00> : vector<64x384xf32>
    %9 = tpu.matmul %1, %8, %cst_9 {dimension_numbers = #tpu.dot_dimension_numbers<[1], [0], [0], [1], [0, 0, 1, 1], [], []>} : vector<64x128xbf16>, vector<128x384xbf16>, vector<64x384xf32> -> vector<64x384xf32>
    %c0_10 = arith.constant 0 : index
    %c0_11 = arith.constant 0 : index
    %10 = vector.load %arg5[%c0_10, %c0_11] : memref<1x384xf32, #tpu.memory_space<vmem>>, vector<1x384xf32>
    %11 = vector.broadcast %10 : vector<1x384xf32> to vector<64x384xf32>
    %12 = arith.addf %9, %11 : vector<64x384xf32>
    %c0_12 = arith.constant 0 : index
    %c0_13 = arith.constant 0 : index
    %13 = vector.load %arg7[%c0_12, %c0_13] : memref<64x384xf32, #tpu.memory_space<vmem>>, vector<64x384xf32>
    tpu.vector_store %arg7[%c0_12, %c0_13], %12 {strides = array<i32>} : memref<64x384xf32, #tpu.memory_space<vmem>>, vector<64x384xf32>,
    return
  }
  func.func @transform_0(%arg0: i32) -> (i32, i32) {
    %c0_i32 = arith.constant 0 : i32
    %c0_i32_0 = arith.constant 0 : i32
    return %arg0, %c0_i32 : i32, i32
  }
  func.func @transform_1(%arg0: i32) -> (i32, i32) {
    %c0_i32 = arith.constant 0 : i32
    %c0_i32_0 = arith.constant 0 : i32
    %c0_i32_1 = arith.constant 0 : i32
    return %c0_i32, %c0_i32_0 : i32, i32
  }
  func.func @transform_2(%arg0: i32) -> (i32, i32) {
    %c0_i32 = arith.constant 0 : i32
    %c0_i32_0 = arith.constant 0 : i32
    %c0_i32_1 = arith.constant 0 : i32
    return %c0_i32, %c0_i32_0 : i32, i32
  }
  func.func @transform_3(%arg0: i32) -> (i32, i32) {
    %c0_i32 = arith.constant 0 : i32
    %c0_i32_0 = arith.constant 0 : i32
    %c0_i32_1 = arith.constant 0 : i32
    return %c0_i32, %c0_i32_0 : i32, i32
  }
  func.func @transform_4(%arg0: i32) -> (i32, i32) {
    %c0_i32 = arith.constant 0 : i32
    %c0_i32_0 = arith.constant 0 : i32
    %c0_i32_1 = arith.constant 0 : i32
    return %c0_i32, %c0_i32_0 : i32, i32
  }
  func.func @transform_5(%arg0: i32) -> (i32, i32) {
    %c0_i32 = arith.constant 0 : i32
    %c0_i32_0 = arith.constant 0 : i32
    return %arg0, %c0_i32 : i32, i32
  }
  func.func @transform_6(%arg0: i32) -> (i32, i32) {
    %c0_i32 = arith.constant 0 : i32
    %c0_i32_0 = arith.constant 0 : i32
    return %arg0, %c0_i32 : i32, i32
  }
}

</mosaic_0001>

<bundles_post_ra>
// kernel: tpu_custom_call.1
= control target key start
LH: loop header
LB: loop body
LE: loop exit
PB: predicated region body
PF: predicated region fallthrough
CT: control target
= control target key end

     0   :  { %12 = vsyncpa [#allocation3], 0  ;;  %s2049_s0 = inlined_call_operand.hbm [shape: f32[128,128], index: 0, kind: input, shape index: {}]   ;;  %s2050_s1 = inlined_call_operand.hbm [shape: bf16[128,384], index: 1, kind: input, shape index: {}]   ;;  %s2051_s2 = inlined_call_operand.hbm [shape: f32[1,384], index: 2, kind: input, shape index: {}]   ;;  %s2052_s3 = inlined_call_operand.hbm [shape: bf16[128,384], index: 3, kind: input, shape index: {}]   ;;  %s2053_s4 = inlined_call_operand.vmem [shape: f32[1,384], index: 4, kind: input, shape index: {}]   ;;  %s2054_s5 = inlined_call_operand.hbm [shape: f32[128,384], index: 5, kind: output, shape index: {0}]   ;;  %s2055_s6 = inlined_call_operand.hbm [shape: f32[128,384], index: 6, kind: output, shape index: {1}]  }
   0x1   :  { %14 = vsyncpa [#allocation3 + $0x1], 0 }
   0x2   :  { %15 = vsyncpa [#allocation6], 0 }
   0x3   :  { %16 = vsyncpa [#allocation9], 0 }
   0x4   :  { %17 = vsyncpa [#allocation4], 0 }
   0x5   :  { %19 = vsyncpa [#allocation4 + $0x1], 0 }
   0x6   :  { %20 = vsyncpa [#allocation12], 0 }
   0x7   :  { %22 = vsyncpa [#allocation12 + $0x1], 0  ;;  %s1721_s21 = smov 0   ;;  %s1723_s22 = smov 0  }
   0x8   :  { %s1725_s23 = smov 0   ;;  %s1727_s24 = smov 0  }
   0x9 LB: > { %s1742_s25 = sadd.s32 4294967295, %s1675_s24   ;;  %s1079_s26 = sadd.s32 4294967294, %s1675_s24   ;;  %s1675_s24 = sphi %s1727_s24, %s2066_s24   ;;  %s1671_s23 = sphi %s1725_s23, %s2065_s23   ;;  %s1667_s22 = sphi %s1723_s22, %s2064_s22   ;;  %s1663_s21 = sphi %s1721_s21, %s2063_s21  }
   0xa   : > { %p48_p0 = scmp.ne.s32.totalorder %s1667_s22, %s1663_s21  ;;  %p49_p1 = scmp.eq.s32.totalorder %s1742_s25, 0 }
   0xb   : > { %p156_p2 = scmp.eq.s32.totalorder %s1742_s25, 1  ;;  %p162_p3 = scmp.eq.s32.totalorder %s1079_s26, 1 }
   0xc   : > { %p1751_p4 = por %p49_p1, %p48_p0  ;;  %p1080_p5 = scmp.ge.s32.totalorder %s1675_s24, 1 }
   0xd   : > { %p1756_p6 = por %p162_p3, %p48_p0  ;;  %p195_p7 = scmp.lt.s32.totalorder %s1675_s24, 3 }
   0xe   : > { %s206_s7 = sshll.u32 %s2050_s1, 4  ;;  %s1677_s9 = smov [#allocation5]   ;;  %s207_s7 = int_to_ptr.hbm [resolvable:$true] %s206_s7 }
   0xf   : > { %p1764_p8 = pnand %p1080_p5, %p195_p7  ;;  %s208_s10 = sshll.u32 %s1677_s9, 4  ;;  %s209_s10 = int_to_ptr.vmem [resolvable:$true] %s208_s10 }
  0x10   : > { %s221_s14 = sshll.u32 %s2051_s2, 4  ;;  %s1678_s15 = smov 192   ;;  %s222_s14 = int_to_ptr.hbm [resolvable:$true] %s221_s14 }
  0x11   : > { %p1379_p9 = pneg %p1764_p8  ;;  %s1679_s16 = smov 12  }
  0x12   : > { %s1680_s17 = smov [#allocation7]   ;;  %s232_s26 = sshll.u32 %s2052_s3, 4  ;;  %s233_s26 = int_to_ptr.hbm [resolvable:$true] %s232_s26 }
  0x13   : > { %p1772_p10 = pnand %p1379_p9, %p49_p1  ;;  %s223_s18 = sshll.u32 %s1680_s17, 4  ;;  %s224_s18 = int_to_ptr.vmem [resolvable:$true] %s223_s18 }
  0x14   : > { %s1681_s29 = smov [#allocation8]   ;;  %p42_p13 = scmp.ne.s32.totalorder %s1671_s23, %s1667_s22 }
  0x15   : > { %1382 = dma.hbm_to_vmem [thread:$0]  (!%p1772_p10), %s207_s7, 3072, %s209_s10, [#allocation6], %s1678_s15, %s1678_s15, %s1679_s16  }
  0x16   : > { %1385 = dma.hbm_to_vmem [thread:$0]  (!%p1772_p10), %s222_s14, 48, %s224_s18, [#allocation6]  }
  0x17   : > { %s234_s30 = sshll.u32 %s1681_s29, 4  ;;  %s1788_s7 = sadd.s32 1, %s1675_s24   ;;  %s235_s30 = int_to_ptr.vmem [resolvable:$true] %s234_s30 }
  0x18   : > { %1388 = dma.hbm_to_vmem [thread:$0]  (!%p1772_p10), %s233_s26, 3072, %s235_s30, [#allocation9], %s1678_s15, %s1678_s15, %s1679_s16  }
  0x19   : > { %s32_s9 = ssub.s32 %s1675_s24, %s1788_s7  ;;  %s35_s10 = sadd.s32 1, %s1671_s23 }
  0x1a   : > { %p33_p12 = scmp.eq.s32.totalorder %s32_s9, 0  ;;  %p43_p0 = scmp.eq.s32.totalorder %s1675_s24, 0 }
  0x1b   : > { %p1403_p3 = scmp.lt.s32.totalorder %s1675_s24, 2  ;;  %p1804_p7 = por %p156_p2, %p42_p13 }
  0x1c   : > { %s1800_s12 = scalar_select %p33_p12, %s1671_s23, %s35_s10  }
  0x1d   : > { %p44_p5 = por %p43_p0, %p42_p13  ;;  %s251_s14 = sand.u32 1, %s1671_s23  }
  0x1e   : > { %s1293_s17 = sshll.u32 %s1675_s24, 6  ;;  %s1085_s11 = sshll.u32 %s251_s14, 6 }
  0x1f   : > { %s260_s16 = scalar_lea.hbm %s2049_s0, %s1293_s17  ;;  %s255_s20 = scalar_lea.vmem [#allocation2], %s1085_s11 }
  0x20   : > { %s261_s19 = sshll.u32 %s260_s16, 4  ;;  %s263_s26 = sshll.u32 %s255_s20, 4  ;;  %s262_s19 = int_to_ptr.hbm [resolvable:$true] %s261_s19  ;;  %s264_s26 = int_to_ptr.vmem [resolvable:$true] %s263_s26 }
  0x21   : > { %p1815_p9 = pnand %p1403_p3, %p44_p5  ;;  %s252_s30 = scalar_lea.sflag [#allocation3], %s251_s14 }
  0x22   : > { %s1539_s9 = sshra.s32 %s262_s19, 4  ;;  %s1546_s18 = scalar_lea.hbm %s2049_s0, 128  ;;  %s1540_s9 = int_to_ptr.hbm [resolvable:$true] %s1539_s9 }
  0x23   : > { %s1541_s10 = scalar_lea.hbm %s1540_s9, 64  ;;  %p1543_p10 = pneg %p1815_p9 }
  0x24   : > { %p1542_p2 = scmp.ne.s32.totalorder %s1540_s9, %s1541_s10  ;;  %p1547_p0 = scmp.lt.s32.totalorder %s1540_s9, %s2049_s0 }
  0x25   : > { %p1548_p3 = scmp.lt.s32.totalorder %s1546_s18, %s1541_s10 }
  0x26   : > { %p1544_p12 = pnand %p1543_p10, %p1542_p2 }
  0x27   : > { %p1549_p5 = por %p1548_p3, %p1547_p0 }
  0x28   : > { %p1545_p13 = pneg %p1544_p12 }
  0x2a   : > { %p1550_p11 = pnand %p1549_p5, %p1545_p13 }
  0x2c   : > { %1553 = shalt.err (!%p1550_p11)
}
  0x2d   : > { %s1682_s14 = smov 128   ;;  %s1683_s20 = smov 8  }
  0x2e   : > { %1392 = dma.hbm_to_vmem [thread:$0]  (!%p1815_p9), %s262_s19, 1024, %s264_s26, %s252_s30, %s1682_s14, %s1682_s14, %s1683_s20  }
  0x2f   : > { %275 = sbr.rel (%p1764_p8) target bundleno = 332 (0x14c), region = 40  ;;  %s1832_s17 = sand.u32 (!%p1764_p8), 1, %s1667_s22  }
  0x30   : > { %s1089_s11 = sshll.u32 (!%p1764_p8), %s1832_s17, 6  ;;  %s278_s9 = scalar_lea.sflag (!%p1764_p8), [#allocation3], %s1832_s17 }
  0x31   : > { %s1836_s10 = scalar_lea.vmem (!%p1764_p8), [#allocation2], %s1089_s11 }
  0x34   : > { %1642 = dma.done.wait (%p1751_p4), %s278_s9, 1024  }
  0x35   : > { %1644 = vsyncadd (%p1751_p4), %s278_s9, 4294966272 }
  0x36   : > { %1646 = dma.done.wait (%p49_p1), [#allocation6], 3120  }
  0x37   : > { %1648 = vsyncadd (%p49_p1), [#allocation6], 4294964176 }
  0x38   : > { %1650 = dma.done.wait (%p49_p1), [#allocation9], 3072  }
  0x39   : > { %1652 = vsyncadd (%p49_p1), [#allocation9], 4294964224  ;;  %v1179_v0 = vld [vmem:[#allocation5 + $0xa8] sm:$0xf]  ;;  %v1316_v1 = vld [vmem:[#allocation5 + $0xb0] sm:$0xf0] }
  0x3a   : > { %v1315_v2 = vld [vmem:[#allocation5 + $0xac] sm:$0xf]  ;;  %v1180_v3 = vor.u32 %v1316_v1, %v1179_v0  ;;  %v1181_v4 = vld [vmem:[#allocation5 + $0xb4] sm:$0xf0]  ;;  %v1167_v5 = vld [vmem:[#allocation5 + $0x90] sm:$0xf] }
  0x3b   : > { %v1313_v6 = vld [vmem:[#allocation5 + $0x98] sm:$0xf0]  ;;  %v1184_v7 = vor.u32 %v1315_v2, %v1181_v4  ;;  %v1312_v8 = vld [vmem:[#allocation5 + $0x94] sm:$0xf]  ;;  %v1169_v9 = vld [vmem:[#allocation5 + $0x9c] sm:$0xf0] }
  0x3c   : > { %514 = vmatpush.bf16.msra.mxu0 %v1180_v3  ;;  %1342 = vmatpush.bf16.msra.mxu2 %v1180_v3  ;;  %v1168_v10 = vor.u32 %v1313_v6, %v1167_v5  ;;  %v1172_v11 = vor.u32 %v1312_v8, %v1169_v9  ;;  %v1155_v12 = vld [vmem:[#allocation5 + $0x78] sm:$0xf]  ;;  %v1310_v13 = vld [vmem:[#allocation5 + $0x80] sm:$0xf0]  ;;  %v1309_v14 = vld [vmem:[#allocation5 + $0x7c] sm:$0xf] }
  0x3d   : > { %543 = vmatpush.bf16.msra.mxu1 %v1184_v7  ;;  %1350 = vmatpush.bf16.msra.mxu3 %v1184_v7  ;;  %v1157_v15 = vld [vmem:[#allocation5 + $0x84] sm:$0xf0]  ;;  %v1156_v16 = vor.u32 %v1310_v13, %v1155_v12  ;;  %v1143_v18 = vld [vmem:[#allocation5 + $0x60] sm:$0xf]  ;;  %v1307_v19 = vld [vmem:[#allocation5 + $0x68] sm:$0xf0] }
  0x3e   : > { %v1160_v17 = vor.u32 %v1309_v14, %v1157_v15  ;;  %v1306_v20 = vld [vmem:[#allocation5 + $0x64] sm:$0xf]  ;;  %v1145_v21 = vld [vmem:[#allocation5 + $0x6c] sm:$0xf0]  ;;  %v1144_v22 = vor.u32 %v1307_v19, %v1143_v18  ;;  %v1131_v24 = vld [vmem:[#allocation5 + $0x48] sm:$0xf] }
  0x3f   : > { %v1148_v23 = vor.u32 %v1306_v20, %v1145_v21  ;;  %v1304_v25 = vld [vmem:[#allocation5 + $0x50] sm:$0xf0]  ;;  %v1303_v26 = vld [vmem:[#allocation5 + $0x4c] sm:$0xf]  ;;  %v1133_v27 = vld [vmem:[#allocation5 + $0x54] sm:$0xf0] }
  0x40   : > { %515 = vmatpush.bf16.msra.mxu0 %v1168_v10  ;;  %1343 = vmatpush.bf16.msra.mxu2 %v1168_v10  ;;  %v1132_v28 = vor.u32 %v1304_v25, %v1131_v24  ;;  %v1136_v29 = vor.u32 %v1303_v26, %v1133_v27  ;;  %v1119_v30 = vld [vmem:[#allocation5 + $0x30] sm:$0xf]  ;;  %v1301_v31 = vld [vmem:[#allocation5 + $0x38] sm:$0xf0]  ;;  %v1300_v32 = vld [vmem:[#allocation5 + $0x34] sm:$0xf] }
  0x41   : > { %544 = vmatpush.bf16.msra.mxu1 %v1172_v11  ;;  %1351 = vmatpush.bf16.msra.mxu3 %v1172_v11  ;;  %v1121_v33 = vld [vmem:[#allocation5 + $0x3c] sm:$0xf0]  ;;  %v1120_v34 = vor.u32 %v1301_v31, %v1119_v30  ;;  %v1107_v36 = vld [vmem:[#allocation5 + $0x18] sm:$0xf]  ;;  %v1298_v37 = vld [vmem:[#allocation5 + $0x20] sm:$0xf0] }
  0x42   : > { %v1124_v35 = vor.u32 %v1300_v32, %v1121_v33  ;;  %v1297_v38 = vld [vmem:[#allocation5 + $0x1c] sm:$0xf]  ;;  %v1109_v39 = vld [vmem:[#allocation5 + $0x24] sm:$0xf0]  ;;  %v1108_v40 = vor.u32 %v1298_v37, %v1107_v36  ;;  %v1095_v42 = vld [vmem:[#allocation5] sm:$0xf] }
  0x43   : > { %v1112_v41 = vor.u32 %v1297_v38, %v1109_v39  ;;  %v1295_v43 = vld [vmem:[#allocation5 + $0x8] sm:$0xf0]  ;;  %v1294_v44 = vld [vmem:[#allocation5 + $0x4] sm:$0xf]  ;;  %v1097_v45 = vld [vmem:[#allocation5 + $0xc] sm:$0xf0] }
  0x44   : > { %516 = vmatpush.bf16.msra.mxu0 %v1156_v16  ;;  %1344 = vmatpush.bf16.msra.mxu2 %v1156_v16  ;;  %v334_v46 = vld [vmem:[%s1836_s10] sm:$0xff]  ;;  %v1187_v47 = vld [vmem:[#allocation5 + $0xb0] sm:$0xf]  ;;  %v1317_v48 = vld [vmem:[#allocation5 + $0xb8] sm:$0xf0]  ;;  %v1096_v51 = vor.u32 %v1295_v43, %v1095_v42  ;;  %v1100_v55 = vor.u32 %v1294_v44, %v1097_v45  ;;  %s1358_s27 = smul.u32 192, %s1832_s17 }
  0x45   : > { %545 = vmatpush.bf16.msra.mxu1 %v1160_v17  ;;  %1352 = vmatpush.bf16.msra.mxu3 %v1160_v17  ;;  %v1275_v49 = vld [vmem:[#allocation8 + $0xa8] sm:$0xf]  ;;  %v1340_v50 = vld [vmem:[#allocation8 + $0xb0] sm:$0xf0]  ;;  %v338_v53 = vld [vmem:[%s1836_s10 + $0x20] sm:$0xff]  ;;  %v1188_v58 = vor.u32 %v1317_v48, %v1187_v47  ;;  %s1359_s30 = smul.u32 192, %s1742_s25 }
  0x46   : > { %v335_v52 = vld [vmem:[%s1836_s10 + $0x8] sm:$0xff]  ;;  %v1339_v56 = vld [vmem:[#allocation8 + $0xac] sm:$0xf]  ;;  %v1277_v57 = vld [vmem:[#allocation8 + $0xb4] sm:$0xf0]  ;;  %v1276_v59 = vor.u32 %v1340_v50, %v1275_v49  ;;  %s1893_s8 = scalar_lea.vmem [#allocation10], %s1358_s27 }
  0x47   : > { %v339_v54 = vld [vmem:[%s1836_s10 + $0x28] sm:$0xff]  ;;  %v1283_v60 = vld [vmem:[#allocation8 + $0xb0] sm:$0xf]  ;;  %v1341_v61 = vld [vmem:[#allocation8 + $0xb8] sm:$0xf0]  ;;  %v1854_v63 = vpack.c.bf16 %v335_v52, %v334_v46  ;;  %v1280_v4 = vor.u32 %v1339_v56, %v1277_v57  ;;  %s1924_s29 = scalar_lea.vmem [#allocation11], %s1358_s27  ;;  %s922_s16 = scalar_lea.hbm %s2054_s5, %s1359_s30 }
  0x48   : > { %517 = vmatpush.bf16.msra.mxu0 %v1144_v22  ;;  %1345 = vmatpush.bf16.msra.mxu2 %v1144_v22  ;;  %v1175_v62 = vld [vmem:[#allocation5 + $0x98] sm:$0xf]  ;;  %v1856_v0 = vpack.c.bf16 %v339_v54, %v338_v53  ;;  %v1314_v1 = vld [vmem:[#allocation5 + $0xa0] sm:$0xf0]  ;;  %v1263_v2 = vld [vmem:[#allocation8 + $0x90] sm:$0xf]  ;;  %v1284_v5 = vor.u32 %v1341_v61, %v1283_v60  ;;  %s940_s11 = scalar_lea.hbm %s2055_s6, %s1359_s30 }
  0x49   : > { %546 = vmatpush.bf16.msra.mxu1 %v1148_v23  ;;  %1353 = vmatpush.bf16.msra.mxu3 %v1148_v23  ;;  %v1337_v3 = vld [vmem:[#allocation8 + $0x98] sm:$0xf0]  ;;  %v1336_v6 = vld [vmem:[#allocation8 + $0x94] sm:$0xf]  ;;  %v1265_v7 = vld [vmem:[#allocation8 + $0x9c] sm:$0xf0]  ;;  %v1176_v8 = vor.u32 %v1314_v1, %v1175_v62 }
  0x4a   : > { %v1264_v9 = vor.u32 %v1337_v3, %v1263_v2  ;;  %v1271_v10 = vld [vmem:[#allocation8 + $0x98] sm:$0xf]  ;;  %v1338_v11 = vld [vmem:[#allocation8 + $0xa0] sm:$0xf0]  ;;  %v1163_v12 = vld [vmem:[#allocation5 + $0x80] sm:$0xf]  ;;  %v1268_v16 = vor.u32 %v1336_v6, %v1265_v7 }
  0x4b   : > { %v1311_v13 = vld [vmem:[#allocation5 + $0x88] sm:$0xf0]  ;;  %v1251_v14 = vld [vmem:[#allocation8 + $0x78] sm:$0xf]  ;;  %v1334_v15 = vld [vmem:[#allocation8 + $0x80] sm:$0xf0]  ;;  %v1272_v17 = vor.u32 %v1338_v11, %v1271_v10 }
  0x4c   : > { %518 = vmatpush.bf16.msra.mxu0 %v1132_v28  ;;  %1346 = vmatpush.bf16.msra.mxu2 %v1132_v28  ;;  %v1333_v18 = vld [vmem:[#allocation8 + $0x7c] sm:$0xf]  ;;  %v1253_v19 = vld [vmem:[#allocation8 + $0x84] sm:$0xf0]  ;;  %v1164_v20 = vor.u32 %v1311_v13, %v1163_v12  ;;  %v1252_v21 = vor.u32 %v1334_v15, %v1251_v14  ;;  %v1259_v22 = vld [vmem:[#allocation8 + $0x80] sm:$0xf] }
  0x4d   : > { %547 = vmatpush.bf16.msra.mxu1 %v1136_v29  ;;  %1354 = vmatpush.bf16.msra.mxu3 %v1136_v29  ;;  %v1335_v23 = vld [vmem:[#allocation8 + $0x88] sm:$0xf0]  ;;  %v1151_v24 = vld [vmem:[#allocation5 + $0x68] sm:$0xf]  ;;  %v1308_v25 = vld [vmem:[#allocation5 + $0x70] sm:$0xf0]  ;;  %v1256_v28 = vor.u32 %v1333_v18, %v1253_v19 }
  0x4e   : > { %v1239_v26 = vld [vmem:[#allocation8 + $0x60] sm:$0xf]  ;;  %v1331_v27 = vld [vmem:[#allocation8 + $0x68] sm:$0xf0]  ;;  %v1260_v29 = vor.u32 %v1335_v23, %v1259_v22  ;;  %v1330_v30 = vld [vmem:[#allocation8 + $0x64] sm:$0xf]  ;;  %v1152_v33 = vor.u32 %v1308_v25, %v1151_v24 }
  0x4f   : > { %v1241_v31 = vld [vmem:[#allocation8 + $0x6c] sm:$0xf0]  ;;  %v1247_v32 = vld [vmem:[#allocation8 + $0x68] sm:$0xf]  ;;  %v1139_v37 = vld [vmem:[#allocation5 + $0x50] sm:$0xf] }
  0x50   : > { %519 = vmatpush.bf16.msra.mxu0 %v1120_v34  ;;  %1347 = vmatpush.bf16.msra.mxu2 %v1120_v34  ;;  %v1240_v34 = vor.u32 %v1331_v27, %v1239_v26  ;;  %v336_v36 = vld [vmem:[%s1836_s10 + $0x10] sm:$0xff]  ;;  %v1305_v38 = vld [vmem:[#allocation5 + $0x58] sm:$0xf0]  ;;  %v1227_v39 = vld [vmem:[#allocation8 + $0x48] sm:$0xf]  ;;  %v1244_v44 = vor.u32 %v1330_v30, %v1241_v31  ;;  %s923_s25 = sshll.u32 %s1893_s8, 4  ;;  %s1994_s25 = int_to_ptr.vmem [resolvable:$true] %s923_s25 }
  0x51   : > { %548 = vmatpush.bf16.msra.mxu1 %v1124_v35  ;;  %1355 = vmatpush.bf16.msra.mxu3 %v1124_v35  ;;  %v1332_v35 = vld [vmem:[#allocation8 + $0x70] sm:$0xf0]  ;;  %v340_v42 = vld [vmem:[%s1836_s10 + $0x30] sm:$0xff]  ;;  %v1229_v47 = vld [vmem:[#allocation8 + $0x54] sm:$0xf0]  ;;  %v1140_v48 = vor.u32 %v1305_v38, %v1139_v37  ;;  %s925_s9 = sshll.u32 %s922_s16, 4  ;;  %s926_s9 = int_to_ptr.hbm [resolvable:$true] %s925_s9 }
  0x52   : > { %v341_v43 = vld [vmem:[%s1836_s10 + $0x38] sm:$0xff]  ;;  %v1248_v45 = vor.u32 %v1332_v35, %v1247_v32  ;;  %v1327_v46 = vld [vmem:[#allocation8 + $0x4c] sm:$0xf]  ;;  %v1235_v50 = vld [vmem:[#allocation8 + $0x50] sm:$0xf]  ;;  %s943_s27 = sshll.u32 %s940_s11, 4  ;;  %s2002_s27 = int_to_ptr.hbm [resolvable:$true] %s943_s27 }
  0x53   : > { %v1127_v52 = vld [vmem:[#allocation5 + $0x38] sm:$0xf]  ;;  %v1868_v54 = vpack.c.bf16 %v341_v43, %v340_v42  ;;  %v1215_v56 = vld [vmem:[#allocation8 + $0x30] sm:$0xf]  ;;  %v1325_v57 = vld [vmem:[#allocation8 + $0x38] sm:$0xf0] }
  0x54   : > { %520 = vmatpush.bf16.msra.mxu0 %v1108_v40  ;;  %1348 = vmatpush.bf16.msra.mxu2 %v1108_v40  ;;  %v1328_v40 = vld [vmem:[#allocation8 + $0x50] sm:$0xf0]  ;;  %v1217_v61 = vld [vmem:[#allocation8 + $0x3c] sm:$0xf0]  ;;  %v1216_v1 = vor.u32 %v1325_v57, %v1215_v56  ;;  %v1223_v2 = vld [vmem:[#allocation8 + $0x38] sm:$0xf] }
  0x55   : > { %549 = vmatpush.bf16.msra.mxu1 %v1112_v41  ;;  %1356 = vmatpush.bf16.msra.mxu3 %v1112_v41  ;;  %v337_v41 = vld [vmem:[%s1836_s10 + $0x18] sm:$0xff]  ;;  %v1228_v49 = vor.u32 %v1328_v40, %v1227_v39  ;;  %v1326_v3 = vld [vmem:[#allocation8 + $0x40] sm:$0xf0]  ;;  %v1321_v10 = vld [vmem:[#allocation8 + $0x1c] sm:$0xf]  ;;  %s941_s10 = sshll.u32 %s1924_s29, 4  ;;  %s2000_s10 = int_to_ptr.vmem [resolvable:$true] %s941_s10 }
  0x56   : > { %v1866_v53 = vpack.c.bf16 %v337_v41, %v336_v36  ;;  %v1324_v60 = vld [vmem:[#allocation8 + $0x34] sm:$0xf]  ;;  %v1203_v6 = vld [vmem:[#allocation8 + $0x18] sm:$0xf]  ;;  %v1322_v7 = vld [vmem:[#allocation8 + $0x20] sm:$0xf0] }
  0x57   : > { %v1205_v11 = vld [vmem:[#allocation8 + $0x24] sm:$0xf0]  ;;  %v1204_v13 = vor.u32 %v1322_v7, %v1203_v6  ;;  %v1211_v14 = vld [vmem:[#allocation8 + $0x20] sm:$0xf]  ;;  %v1323_v15 = vld [vmem:[#allocation8 + $0x28] sm:$0xf0] }
  0x58   : > { %521 = vmatpush.bf16.msra.mxu0 %v1096_v51  ;;  %1349 = vmatpush.bf16.msra.mxu2 %v1096_v51  ;;  %v1329_v51 = vld [vmem:[#allocation8 + $0x58] sm:$0xf0]  ;;  %v1191_v18 = vld [vmem:[#allocation8] sm:$0xf]  ;;  %v1319_v19 = vld [vmem:[#allocation8 + $0x8] sm:$0xf0] }
  0x59   : > { %550 = vmatpush.bf16.msra.mxu1 %v1100_v55  ;;  %1357 = vmatpush.bf16.msra.mxu3 %v1100_v55  ;;  %v1302_v55 = vld [vmem:[#allocation5 + $0x40] sm:$0xf0]  ;;  %v1318_v22 = vld [vmem:[#allocation8 + $0x4] sm:$0xf]  ;;  %v1192_v24 = vor.u32 %v1319_v19, %v1191_v18  ;;  %v1193_v25 = vld [vmem:[#allocation8 + $0xc] sm:$0xf0] }
  0x5a   : > { %v1128_v62 = vor.u32 %v1302_v55, %v1127_v52  ;;  %v1199_v26 = vld [vmem:[#allocation8 + $0x8] sm:$0xf]  ;;  %v1320_v27 = vld [vmem:[#allocation8 + $0x10] sm:$0xf0]  ;;  %s905_s19 = scalar_lea.sflag [#allocation4], %s1832_s17  ;;  %s1583_s26 = sshra.s32 %s926_s9, 4  ;;  %s1584_s26 = int_to_ptr.hbm [resolvable:$true] %s1583_s26 }
  0x5b   : > { %522 = vmatmul.bf16.vlgmr.msra.gmra.mxu0 %v1854_v63  ;;  %532 = vmatmul.bf16.vlgmr.msra.gmra.mxu2 %v1856_v0  ;;  %s1585_s30 = scalar_lea.hbm %s1584_s26, 192  ;;  %s1589_s16 = scalar_lea.hbm %s2054_s5, 384 }
  0x5c   : > { %572 = vmatpush.bf16.msrb.mxu2 %v1188_v58  ;;  %551 = vmatmul.bf16.vlgmr.msra.gmra.mxu1 %v1854_v63  ;;  %v1232_v58 = vor.u32 %v1327_v46, %v1229_v47  ;;  %p1586_p1 = scmp.ne.s32.totalorder %s1584_s26, %s1585_s30  ;;  %p1590_p11 = scmp.lt.s32.totalorder %s1584_s26, %s2054_s5 }
  0x5d   : > { %793 = vmatpush.bf16.msrb.mxu3 %v1276_v59  ;;  %822 = vmatpush.bf16.msrb.mxu0 %v1280_v4  ;;  %v1236_v59 = vor.u32 %v1329_v51, %v1235_v50  ;;  %v1115_v4 = vld [vmem:[#allocation5 + $0x20] sm:$0xf]  ;;  %p1591_p9 = scmp.lt.s32.totalorder %s1589_s16, %s1585_s30 }
  0x5e   : > { %561 = vmatmul.bf16.vlgmr.msra.gmra.mxu3 %v1856_v0  ;;  %851 = vmatpush.bf16.msrb.mxu1 %v1284_v5  ;;  %v1299_v5 = vld [vmem:[#allocation5 + $0x28] sm:$0xf0]  ;;  %p1587_p4 = pnand %p1586_p1, %p1804_p7 }
  0x5f   : > { %v1116_v12 = vor.u32 %v1299_v5, %v1115_v4  ;;  %p1592_p2 = por %p1591_p9, %p1590_p11 }
  0x60   : > { %573 = vmatpush.bf16.msrb.mxu2 %v1176_v8  ;;  %v1220_v8 = vor.u32 %v1324_v60, %v1217_v61  ;;  %p1588_p8 = pneg %p1587_p4 }
  0x61   : > { %794 = vmatpush.bf16.msrb.mxu3 %v1264_v9  ;;  %823 = vmatpush.bf16.msrb.mxu0 %v1268_v16  ;;  %v1224_v9 = vor.u32 %v1326_v3, %v1223_v2  ;;  %v1103_v16 = vld [vmem:[#allocation5 + $0x8] sm:$0xf] }
  0x62   : > { %852 = vmatpush.bf16.msrb.mxu1 %v1272_v17  ;;  %v1296_v17 = vld [vmem:[#allocation5 + $0x10] sm:$0xf0]  ;;  %p1593_p10 = pnand %p1592_p2, %p1588_p8 }
  0x63   : > { %v1104_v23 = vor.u32 %v1296_v17, %v1103_v16 }
  0x64   : > { %574 = vmatpush.bf16.msrb.mxu2 %v1164_v20  ;;  %v1208_v20 = vor.u32 %v1321_v10, %v1205_v11 }
  0x65   : > { %795 = vmatpush.bf16.msrb.mxu3 %v1252_v21  ;;  %824 = vmatpush.bf16.msrb.mxu0 %v1256_v28  ;;  %v1212_v21 = vor.u32 %v1323_v15, %v1211_v14  ;;  %v1196_v28 = vor.u32 %v1318_v22, %v1193_v25 }
  0x66   : > { %853 = vmatpush.bf16.msrb.mxu1 %v1260_v29  ;;  %v1200_v29 = vor.u32 %v1320_v27, %v1199_v26 }
  0x68   : > { %575 = vmatpush.bf16.msrb.mxu2 %v1152_v33 }
  0x69   : > { %796 = vmatpush.bf16.msrb.mxu3 %v1240_v34  ;;  %825 = vmatpush.bf16.msrb.mxu0 %v1244_v44 }
  0x6a   : > { %854 = vmatpush.bf16.msrb.mxu1 %v1248_v45 }
  0x6b   : > { %527 = vmatmul.bf16.gmra.mxu0 %v1866_v53  ;;  %537 = vmatmul.bf16.gmra.mxu2 %v1868_v54 }
  0x6c   : > { %576 = vmatpush.bf16.msrb.mxu2 %v1140_v48  ;;  %556 = vmatmul.bf16.gmra.mxu1 %v1866_v53 }
  0x6d   : > { %797 = vmatpush.bf16.msrb.mxu3 %v1228_v49  ;;  %826 = vmatpush.bf16.msrb.mxu0 %v1232_v58 }
  0x6e   : > { %566 = vmatmul.bf16.gmra.mxu3 %v1868_v54  ;;  %855 = vmatpush.bf16.msrb.mxu1 %v1236_v59  ;;  %v657_v59 = vld [vmem:[%s2053_s4] sm:$0x7] }
  0x6f   : > { %v1912_v61 = vperm.slane %v657_v59, 1  ;;  %v1914_v2 = vperm.slane %v657_v59, 2 }
  0x70   : > { %577 = vmatpush.bf16.msrb.mxu2 %v1128_v62 }
  0x71   : > { %798 = vmatpush.bf16.msrb.mxu3 %v1216_v1  ;;  %827 = vmatpush.bf16.msrb.mxu0 %v1220_v8 }
  0x72   : > { %856 = vmatpush.bf16.msrb.mxu1 %v1224_v9  ;;  %v1927_v9 = vperm.slane %v657_v59, 0 }
  0x74   : > { %578 = vmatpush.bf16.msrb.mxu2 %v1116_v12 }
  0x75   : > { %799 = vmatpush.bf16.msrb.mxu3 %v1204_v13  ;;  %828 = vmatpush.bf16.msrb.mxu0 %v1208_v20 }
  0x76   : > { %857 = vmatpush.bf16.msrb.mxu1 %v1212_v21 }
  0x78   : > { %579 = vmatpush.bf16.msrb.mxu2 %v1104_v23 }
  0x79   : > { %800 = vmatpush.bf16.msrb.mxu3 %v1192_v24  ;;  %829 = vmatpush.bf16.msrb.mxu0 %v1196_v28 }
  0x7a   : > { %858 = vmatpush.bf16.msrb.mxu1 %v1200_v29 }
  0x7b   : > { %580 = vmatmul.bf16.vlgmr.msrb.gmra.mxu2 %v1854_v63 }
  0x7c   : > { %830 = vmatmul.bf16.vlgmr.msrb.gmra.mxu0 %v1854_v63 }
  0x7d   : > { %859 = vmatmul.bf16.vlgmr.msrb.gmra.mxu1 %v1854_v63 }
  0x7e   : > { %801 = vmatmul.bf16.vlgmr.msrb.gmra.mxu3 %v1854_v63  ;;  %v378_v63 = vld [vmem:[#allocation7] sm:$0x7] }
  0x7f   : > { %v380_v30 = vperm.slane %v378_v63, 0  ;;  %v381_v31 = vperm.slane %v378_v63, 1  ;;  %v1920_v8 = vperm.slane %v378_v63, 2 }
  0x8b   : > { %585 = vmatmul.bf16.gmra.mxu2 %v1866_v53 }
  0x8c   : > { %835 = vmatmul.bf16.gmra.mxu0 %v1866_v53 }
  0x8d   : > { %864 = vmatmul.bf16.gmra.mxu1 %v1866_v53 }
  0x8e   : > { %806 = vmatmul.bf16.gmra.mxu3 %v1866_v53 }
  0x9b   : > { %590 = vmatmul.bf16.gmra.mxu2 %v1856_v0 }
  0x9c   : > { %840 = vmatmul.bf16.gmra.mxu0 %v1856_v0 }
  0x9d   : > { %869 = vmatmul.bf16.gmra.mxu1 %v1856_v0 }
  0x9e   : > { %811 = vmatmul.bf16.gmra.mxu3 %v1856_v0 }
  0xab   : > { %595 = vmatmul.bf16.gmra.mxu2 %v1868_v54 }
  0xac   : > { %845 = vmatmul.bf16.gmra.mxu0 %v1868_v54 }
  0xad   : > { %874 = vmatmul.bf16.gmra.mxu1 %v1868_v54 }
  0xae   : > { %816 = vmatmul.bf16.gmra.mxu3 %v1868_v54 }
  0xd8   : > { %v523_v32 = vpop.f32.mrf.mxu0 }
  0xd9   : > { %v524_v33 = vadd.f32 %v523_v32, %v380_v30  ;;  %v552_v34 = vpop.f32.mrf.mxu1 }
  0xda   : > { %v553_v35 = vadd.f32 %v552_v34, %v381_v31 }
  0xdb   : > { %601 = vst [vmem:[%s1893_s8] sm:$0xff] %v524_v33 }
  0xdc   : > { %602 = vst [vmem:[%s1893_s8 + $0x8] sm:$0xff] %v553_v35 }
  0xde   : > { %v533_v0 = vpop.f32.mrf.mxu2 }
  0xdf   : > { %v534_v36 = vadd.f32 %v533_v0, %v380_v30 }
  0xe0   : > { %v525_v39 = vpop.f32.mrf.mxu0 }
  0xe1   : > { %v562_v37 = vpop.f32.mrf.mxu3  ;;  %613 = vst [vmem:[%s1893_s8 + $0x60] sm:$0xff] %v534_v36  ;;  %v526_v40 = vadd.f32 %v525_v39, %v380_v30  ;;  %v554_v41 = vpop.f32.mrf.mxu1 }
  0xe2   : > { %v563_v38 = vadd.f32 %v562_v37, %v381_v31  ;;  %v555_v42 = vadd.f32 %v554_v41, %v381_v31 }
  0xe3   : > { %604 = vst [vmem:[%s1893_s8 + $0x18] sm:$0xff] %v526_v40 }
  0xe4   : > { %614 = vst [vmem:[%s1893_s8 + $0x68] sm:$0xff] %v563_v38 }
  0xe5   : > { %605 = vst [vmem:[%s1893_s8 + $0x20] sm:$0xff] %v555_v42 }
  0xe6   : > { %v535_v43 = vpop.f32.mrf.mxu2 }
  0xe7   : > { %v536_v44 = vadd.f32 %v535_v43, %v380_v30 }
  0xe8   : > { %v528_v47 = vpop.f32.mrf.mxu0 }
  0xe9   : > { %v564_v45 = vpop.f32.mrf.mxu3  ;;  %616 = vst [vmem:[%s1893_s8 + $0x78] sm:$0xff] %v536_v44  ;;  %v529_v48 = vadd.f32 %v528_v47, %v380_v30  ;;  %v557_v49 = vpop.f32.mrf.mxu1 }
  0xea   : > { %v565_v46 = vadd.f32 %v564_v45, %v381_v31  ;;  %v558_v50 = vadd.f32 %v557_v49, %v381_v31 }
  0xeb   : > { %607 = vst [vmem:[%s1893_s8 + $0x30] sm:$0xff] %v529_v48 }
  0xec   : > { %617 = vst [vmem:[%s1893_s8 + $0x80] sm:$0xff] %v565_v46 }
  0xed   : > { %608 = vst [vmem:[%s1893_s8 + $0x38] sm:$0xff] %v558_v50 }
  0xee   : > { %v538_v51 = vpop.f32.mrf.mxu2 }
  0xef   : > { %v539_v52 = vadd.f32 %v538_v51, %v380_v30 }
  0xf0   : > { %v530_v55 = vpop.f32.mrf.mxu0 }
  0xf1   : > { %v567_v53 = vpop.f32.mrf.mxu3  ;;  %619 = vst [vmem:[%s1893_s8 + $0x90] sm:$0xff] %v539_v52  ;;  %v531_v56 = vadd.f32 %v530_v55, %v380_v30  ;;  %v559_v57 = vpop.f32.mrf.mxu1 }
  0xf2   : > { %v568_v54 = vadd.f32 %v567_v53, %v381_v31  ;;  %v560_v58 = vadd.f32 %v559_v57, %v381_v31 }
  0xf3   : > { %610 = vst [vmem:[%s1893_s8 + $0x48] sm:$0xff] %v531_v56 }
  0xf4   : > { %620 = vst [vmem:[%s1893_s8 + $0x98] sm:$0xff] %v568_v54 }
  0xf5   : > { %611 = vst [vmem:[%s1893_s8 + $0x50] sm:$0xff] %v560_v58 }
  0xf6   : > { %v540_v60 = vpop.f32.mrf.mxu2 }
  0xf7   : > { %v541_v62 = vadd.f32 %v540_v60, %v380_v30 }
  0xf9   : > { %v569_v1 = vpop.f32.mrf.mxu3  ;;  %622 = vst [vmem:[%s1893_s8 + $0xa8] sm:$0xff] %v541_v62  ;;  %v831_v4 = vpop.f32.mrf.mxu0 }
  0xfa   : > { %v570_v3 = vadd.f32 %v569_v1, %v381_v31  ;;  %v832_v5 = vadd.f32 %v831_v4, %v1912_v61  ;;  %v860_v6 = vpop.f32.mrf.mxu1 }
  0xfb   : > { %v861_v7 = vadd.f32 %v860_v6, %v1914_v2 }
  0xfc   : > { %623 = vst [vmem:[%s1893_s8 + $0xb0] sm:$0xff] %v570_v3 }
  0xfd   : > { %881 = vst [vmem:[%s1924_s29 + $0x8] sm:$0xff] %v832_v5 }
  0xfe   : > { %882 = vst [vmem:[%s1924_s29 + $0x10] sm:$0xff] %v861_v7  ;;  %v581_v10 = vpop.f32.mrf.mxu2 }
  0xff   : > { %v582_v11 = vadd.f32 %v581_v10, %v1920_v8 }
 0x101   : > { %v802_v12 = vpop.f32.mrf.mxu3  ;;  %603 = vst [vmem:[%s1893_s8 + $0x10] sm:$0xff] %v582_v11  ;;  %v833_v14 = vpop.f32.mrf.mxu0 }
 0x102   : > { %v803_v13 = vadd.f32 %v802_v12, %v1927_v9  ;;  %v834_v15 = vadd.f32 %v833_v14, %v1912_v61  ;;  %v862_v16 = vpop.f32.mrf.mxu1 }
 0x103   : > { %v863_v17 = vadd.f32 %v862_v16, %v1914_v2 }
 0x104   : > { %880 = vst [vmem:[%s1924_s29] sm:$0xff] %v803_v13 }
 0x105   : > { %884 = vst [vmem:[%s1924_s29 + $0x20] sm:$0xff] %v834_v15 }
 0x106   : > { %885 = vst [vmem:[%s1924_s29 + $0x28] sm:$0xff] %v863_v17  ;;  %v583_v18 = vpop.f32.mrf.mxu2 }
 0x107   : > { %v584_v19 = vadd.f32 %v583_v18, %v1920_v8 }
 0x109   : > { %v804_v20 = vpop.f32.mrf.mxu3  ;;  %606 = vst [vmem:[%s1893_s8 + $0x28] sm:$0xff] %v584_v19  ;;  %v836_v22 = vpop.f32.mrf.mxu0 }
 0x10a   : > { %v805_v21 = vadd.f32 %v804_v20, %v1927_v9  ;;  %v837_v23 = vadd.f32 %v836_v22, %v1912_v61  ;;  %v865_v24 = vpop.f32.mrf.mxu1 }
 0x10b   : > { %v866_v25 = vadd.f32 %v865_v24, %v1914_v2 }
 0x10c   : > { %883 = vst [vmem:[%s1924_s29 + $0x18] sm:$0xff] %v805_v21 }
 0x10d   : > { %887 = vst [vmem:[%s1924_s29 + $0x38] sm:$0xff] %v837_v23 }
 0x10e   : > { %888 = vst [vmem:[%s1924_s29 + $0x40] sm:$0xff] %v866_v25  ;;  %v586_v26 = vpop.f32.mrf.mxu2 }
 0x10f   : > { %v587_v27 = vadd.f32 %v586_v26, %v1920_v8 }
 0x111   : > { %v807_v28 = vpop.f32.mrf.mxu3  ;;  %609 = vst [vmem:[%s1893_s8 + $0x40] sm:$0xff] %v587_v27  ;;  %v838_v63 = vpop.f32.mrf.mxu0 }
 0x112   : > { %v808_v29 = vadd.f32 %v807_v28, %v1927_v9  ;;  %v839_v30 = vadd.f32 %v838_v63, %v1912_v61  ;;  %v867_v31 = vpop.f32.mrf.mxu1 }
 0x113   : > { %v868_v32 = vadd.f32 %v867_v31, %v1914_v2 }
 0x114   : > { %886 = vst [vmem:[%s1924_s29 + $0x30] sm:$0xff] %v808_v29 }
 0x115   : > { %890 = vst [vmem:[%s1924_s29 + $0x50] sm:$0xff] %v839_v30 }
 0x116   : > { %891 = vst [vmem:[%s1924_s29 + $0x58] sm:$0xff] %v868_v32  ;;  %v588_v33 = vpop.f32.mrf.mxu2 }
 0x117   : > { %v589_v34 = vadd.f32 %v588_v33, %v1920_v8 }
 0x119   : > { %v809_v35 = vpop.f32.mrf.mxu3  ;;  %612 = vst [vmem:[%s1893_s8 + $0x58] sm:$0xff] %v589_v34  ;;  %v841_v36 = vpop.f32.mrf.mxu0 }
 0x11a   : > { %v810_v0 = vadd.f32 %v809_v35, %v1927_v9  ;;  %v842_v37 = vadd.f32 %v841_v36, %v1912_v61  ;;  %v870_v38 = vpop.f32.mrf.mxu1 }
 0x11b   : > { %v871_v39 = vadd.f32 %v870_v38, %v1914_v2 }
 0x11c   : > { %889 = vst [vmem:[%s1924_s29 + $0x48] sm:$0xff] %v810_v0 }
 0x11d   : > { %893 = vst [vmem:[%s1924_s29 + $0x68] sm:$0xff] %v842_v37 }
 0x11e   : > { %894 = vst [vmem:[%s1924_s29 + $0x70] sm:$0xff] %v871_v39  ;;  %v591_v40 = vpop.f32.mrf.mxu2 }
 0x11f   : > { %v592_v41 = vadd.f32 %v591_v40, %v1920_v8 }
 0x121   : > { %v812_v42 = vpop.f32.mrf.mxu3  ;;  %615 = vst [vmem:[%s1893_s8 + $0x70] sm:$0xff] %v592_v41  ;;  %v843_v44 = vpop.f32.mrf.mxu0 }
 0x122   : > { %v813_v43 = vadd.f32 %v812_v42, %v1927_v9  ;;  %v844_v45 = vadd.f32 %v843_v44, %v1912_v61  ;;  %v872_v46 = vpop.f32.mrf.mxu1 }
 0x123   : > { %v873_v47 = vadd.f32 %v872_v46, %v1914_v2 }
 0x124   : > { %892 = vst [vmem:[%s1924_s29 + $0x60] sm:$0xff] %v813_v43 }
 0x125   : > { %896 = vst [vmem:[%s1924_s29 + $0x80] sm:$0xff] %v844_v45 }
 0x126   : > { %897 = vst [vmem:[%s1924_s29 + $0x88] sm:$0xff] %v873_v47  ;;  %v593_v48 = vpop.f32.mrf.mxu2 }
 0x127   : > { %v594_v49 = vadd.f32 %v593_v48, %v1920_v8 }
 0x129   : > { %v814_v50 = vpop.f32.mrf.mxu3  ;;  %618 = vst [vmem:[%s1893_s8 + $0x88] sm:$0xff] %v594_v49  ;;  %v846_v52 = vpop.f32.mrf.mxu0 }
 0x12a   : > { %v815_v51 = vadd.f32 %v814_v50, %v1927_v9  ;;  %v847_v53 = vadd.f32 %v846_v52, %v1912_v61  ;;  %v875_v54 = vpop.f32.mrf.mxu1 }
 0x12b   : > { %v876_v55 = vadd.f32 %v875_v54, %v1914_v2 }
 0x12c   : > { %895 = vst [vmem:[%s1924_s29 + $0x78] sm:$0xff] %v815_v51 }
 0x12d   : > { %899 = vst [vmem:[%s1924_s29 + $0x98] sm:$0xff] %v847_v53 }
 0x12e   : > { %900 = vst [vmem:[%s1924_s29 + $0xa0] sm:$0xff] %v876_v55  ;;  %v596_v56 = vpop.f32.mrf.mxu2 }
 0x12f   : > { %v597_v57 = vadd.f32 %v596_v56, %v1920_v8 }
 0x131   : > { %v817_v58 = vpop.f32.mrf.mxu3  ;;  %621 = vst [vmem:[%s1893_s8 + $0xa0] sm:$0xff] %v597_v57  ;;  %v848_v60 = vpop.f32.mrf.mxu0 }
 0x132   : > { %v818_v59 = vadd.f32 %v817_v58, %v1927_v9  ;;  %v849_v62 = vadd.f32 %v848_v60, %v1912_v61  ;;  %v877_v1 = vpop.f32.mrf.mxu1 }
 0x133   : > { %v878_v3 = vadd.f32 %v877_v1, %v1914_v2 }
 0x134   : > { %898 = vst [vmem:[%s1924_s29 + $0x90] sm:$0xff] %v818_v59 }
 0x135   : > { %902 = vst [vmem:[%s1924_s29 + $0xb0] sm:$0xff] %v849_v62 }
 0x136   : > { %903 = vst [vmem:[%s1924_s29 + $0xb8] sm:$0xff] %v878_v3  ;;  %v598_v4 = vpop.f32.mrf.mxu2 }
 0x137   : > { %v599_v61 = vadd.f32 %v598_v4, %v1920_v8 }
 0x139   : > { %v819_v5 = vpop.f32.mrf.mxu3  ;;  %624 = vst [vmem:[%s1893_s8 + $0xb8] sm:$0xff] %v599_v61 }
 0x13a   : > { %v820_v2 = vadd.f32 %v819_v5, %v1927_v9 }
 0x13c   : > { %901 = vst [vmem:[%s1924_s29 + $0xa8] sm:$0xff] %v820_v2 }
 0x13d   : > { %1596 = shalt.err (!%p1593_p10)
}
 0x13e   : > { %s1684_s8 = smov 384   ;;  %s1685_s29 = smov 24  }
 0x13f   : > { %1375 = dma.vmem_to_hbm [thread:$0]  (%p1804_p7), %s1994_s25, 3072, %s926_s9, %s905_s19, %s1684_s8, %s1684_s8, %s1685_s29  }
 0x140   : > { %s910_s11 = scalar_lea.sflag [#allocation12], %s1832_s17  ;;  %s1611_s18 = sshra.s32 %s2002_s27, 4  ;;  %s1612_s18 = int_to_ptr.hbm [resolvable:$true] %s1611_s18 }
 0x141   : > { %s1613_s15 = scalar_lea.hbm %s1612_s18, 192  ;;  %s1617_s16 = scalar_lea.hbm %s2055_s6, 384 }
 0x142   : > { %p1614_p12 = scmp.ne.s32.totalorder %s1612_s18, %s1613_s15  ;;  %p1618_p3 = scmp.lt.s32.totalorder %s1612_s18, %s2055_s6 }
 0x143   : > { %p1619_p5 = scmp.lt.s32.totalorder %s1617_s16, %s1613_s15 }
 0x144   : > { %p1615_p13 = pnand %p1614_p12, %p1804_p7 }
 0x145   : > { %p1620_p1 = por %p1619_p5, %p1618_p3 }
 0x146   : > { %p1616_p0 = pneg %p1615_p13 }
 0x148   : > { %p1621_p4 = pnand %p1620_p1, %p1616_p0 }
 0x14a   : > { %1624 = shalt.err (!%p1621_p4)
}
 0x14b   : > { %1376 = dma.vmem_to_hbm [thread:$0]  (%p1804_p7), %s2000_s10, 3072, %s2002_s27, %s910_s11, %s1684_s8, %s1684_s8, %s1685_s29  }
 0x14c PF: > { %s958_s17 = sand.u32 1, %s1663_s21   ;;  %p2062_p8 = scmp.ge.s32.totalorder %s1675_s24, 2 }
 0x14d   : > { %s959_s25 = scalar_lea.sflag [#allocation4], %s958_s17 }
 0x14e   : > { %p1394_p11 = pnand %p2062_p8, %p1756_p6 }
 0x150   : > { %p1395_p9 = pneg %p1394_p11 }
 0x152   : > { %1654 = dma.done.wait (%p1395_p9), %s959_s25, 3072  }
 0x153   : > { %1656 = vsyncadd (%p1395_p9), %s959_s25, 4294964224  ;;  %s969_s9 = scalar_lea.sflag [#allocation12], %s958_s17 }
 0x154   : > { %1658 = dma.done.wait (%p1395_p9), %s969_s9, 3072  }
 0x155   : > { %1660 = vsyncadd (%p1395_p9), %s969_s9, 4294964224  ;;  %p25_p7 = scmp.ge.s32.totalorder %s1788_s7, 4   ;;  %s2063_s21 = smov %s1667_s22 }
 0x156   : > { %s2064_s22 = smov %s1671_s23  ;;  %s2065_s23 = smov %s1800_s12 }
 0x157   : > { %s2066_s24 = smov %s1788_s7  ;;  %27 = sbr.rel (!%p25_p7) target bundleno = 9 (0x9), region = 114 }
 0x15c   :  { %975 = vsyncpa [#allocation3], 1 }
 0x15d   :  { %977 = vsyncpa [#allocation3 + $0x1], 1 }
 0x15e   :  { %978 = vsyncpa [#allocation6], 1 }
 0x15f   :  { %979 = vsyncpa [#allocation9], 1 }
 0x160   :  { %980 = vsyncpa [#allocation4], 1 }
 0x161   :  { %982 = vsyncpa [#allocation4 + $0x1], 1 }
 0x162   :  { %983 = vsyncpa [#allocation12], 1 }
 0x163   :  { %985 = vsyncpa [#allocation12 + $0x1], 1 }

</bundles_post_ra>
